<compile_context>
chip_gen: v7x
topology: tpu7x:2x2x1
jax: 0.10.0
libtpu: 0.0.40
codegen_flags: <defaults>
</compile_context>

<pallas_src>
import jax
import jax.numpy as jnp
import numpy as np
from jax.experimental import pallas as pl
from jax.experimental.pallas import tpu as pltpu


def _round_up(x, m):
    return (x + m - 1) // m * m


def _pick_tile(n128):
    # Largest tile (<= 2048, v7x-VMEM friendly) that does not inflate the padded
    # node count by more than ~12.5%.
    for t in (2048, 1024, 512, 256, 128):
        if t <= n128 and (_round_up(n128, t) - n128) * 8 <= n128:
            return t
    return n128


# -----------------------------------------------------------------------------
# Pallas kernel: streamed  out += adj_counts @ (x @ W_l^T), f32 row-scale at end
# -----------------------------------------------------------------------------
def _sage_kernel(adj_ref, xw_ref, inv_deg_ref, root_ref, o_ref):
    k = pl.program_id(1)

    @pl.when(k == 0)
    def _():
        o_ref[...] = jnp.zeros_like(o_ref)

    # int8 edge counts -> bf16 on the VPU, feeding the bf16 MXU path with f32 acc.
    a = adj_ref[...].astype(xw_ref.dtype)
    o_ref[...] += jnp.dot(a, xw_ref[...], preferred_element_type=jnp.float32)

    @pl.when(k == pl.num_programs(1) - 1)
    def _():
        # mean-normalize with the exact f32 per-row 1/deg, add root term + bias.
        o_ref[...] = o_ref[...] * inv_deg_ref[...] + root_ref[...]


def sage_conv_pallas(x, edge_index, w_l, b_l, w_r, *, dropout_p=0.5,
                     training=True, rng_key=None):
    """One SAGEConv layer (normalize=False) with preceding dropout, on TPU."""
    n, c_in = x.shape
    c_out = w_l.shape[0]

    x = jnp.asarray(x, jnp.float32)
    w_l = jnp.asarray(w_l, jnp.float32)
    w_r = jnp.asarray(w_r, jnp.float32)
    b_l = jnp.asarray(b_l, jnp.float32)

    # --- dropout in the wrapper: one mask, shared by the agg and root paths.
    if training and dropout_p > 0.0:
        if rng_key is None:   # NOTE: fixed default key => identical mask each call
            rng_key = jax.random.PRNGKey(0)
        keep = jax.random.bernoulli(rng_key, 1.0 - float(dropout_p), x.shape)
        x = jnp.where(keep, x * (1.0 / (1.0 - float(dropout_p))), 0.0)

    # --- tiling / padding (lane-dense 128 feature pad; big square adjacency tiles)
    c_out_p = _round_up(c_out, 128)
    n128 = _round_up(n, 128)
    tile = _pick_tile(n128)
    tm = tk = tile
    n_pad = _round_up(n, tile)

    src = jnp.asarray(edge_index[0], jnp.int32)
    dst = jnp.asarray(edge_index[1], jnp.int32)

    # Unnormalized in-edge counts, built directly at the padded shape.
    # TODO(synk): per-pair multiplicities > 127 are clamped (int8 range); fall back
    # to bf16 counts for such multigraphs.
    counts = jnp.zeros((n_pad, n_pad), jnp.int32).at[dst, src].add(1)
    adj_i8 = jnp.clip(counts, 0, 127).astype(jnp.int8)

    deg = jnp.zeros((n_pad,), jnp.float32).at[dst].add(1.0)
    inv_deg = (1.0 / jnp.maximum(deg, 1.0)).reshape(n_pad, 1)   # deg 0 rows stay 0

    # Small O(N*Cin*Cout) projections done once in the wrapper (f32, then bf16 for
    # the MXU operand; the root term stays f32 and is added in the finalize).
    xw = jnp.zeros((n_pad, c_out_p), jnp.bfloat16).at[:n, :c_out].set(
        (x @ w_l.T).astype(jnp.bfloat16))
    root = jnp.zeros((n_pad, c_out_p), jnp.float32).at[:n, :c_out].set(
        x @ w_r.T + b_l[None, :])

    grid = (n_pad // tm, n_pad // tk)

    # VMEM budget: double-buffered int8 adj + bf16 xw tiles, f32 inv_deg/root/out.
    working = (2 * (tm * tk * 1 + tk * c_out_p * 2 + tm * 4 + tm * c_out_p * 4)
               + 2 * tm * c_out_p * 4)
    vmem_limit = int(min(48 * 2**20, max(8 * 2**20, 2 * working)))   # v7x-safe cap

    out = pl.pallas_call(
        _sage_kernel,
        out_shape=jax.ShapeDtypeStruct((n_pad, c_out_p), jnp.float32),
        grid_spec=pltpu.PrefetchScalarGridSpec(
            num_scalar_prefetch=0,
            grid=grid,
            in_specs=[
                pl.BlockSpec((tm, tk), lambda i, k: (i, k)),         # int8 counts
                pl.BlockSpec((tk, c_out_p), lambda i, k: (k, 0)),    # x @ W_l^T (bf16)
                pl.BlockSpec((tm, 1), lambda i, k: (i, 0)),          # 1/deg (f32)
                pl.BlockSpec((tm, c_out_p), lambda i, k: (i, 0)),    # root + bias (f32)
            ],
            out_specs=pl.BlockSpec((tm, c_out_p), lambda i, k: (i, 0)),
        ),
        compiler_params=pltpu.CompilerParams(
            dimension_semantics=("parallel", "arbitrary"),
            vmem_limit_bytes=vmem_limit),
    )(adj_i8, xw, inv_deg, root)

    return out[:n, :c_out]


# -----------------------------------------------------------------------------
# GCN module equivalent (one SAGEConv layer, dropout before it)
# -----------------------------------------------------------------------------
class GCNPallas:
    def __init__(self, in_channels, out_channels, dropout=0.5, key=None):
        key = jax.random.PRNGKey(0) if key is None else key
        k1, k2, k3 = jax.random.split(key, 3)
        scale = 1.0 / np.sqrt(in_channels)
        # lin_l: (out, in) with bias; lin_r: (out, in) without bias
        self.w_l = jax.random.uniform(k1, (out_channels, in_channels),
                                      jnp.float32, -scale, scale)
        self.b_l = jax.random.uniform(k2, (out_channels,),
                                      jnp.float32, -scale, scale)
        self.w_r = jax.random.uniform(k3, (out_channels, in_channels),
                                      jnp.float32, -scale, scale)
        self.dropout = dropout

    def __call__(self, x, edge_index, training=True, rng_key=None):
        return sage_conv_pallas(x, edge_index, self.w_l, self.b_l, self.w_r,
                                dropout_p=self.dropout, training=training,
                                rng_key=rng_key)


def _reference_eval(x, edge_index, w_l, b_l, w_r):
    # training=False reference (dropout is identity) in plain JAX, f32
    n = x.shape[0]
    src, dst = edge_index[0], edge_index[1]
    a = jnp.zeros((n, n), jnp.float32).at[dst, src].add(1.0)
    deg = a.sum(axis=1, keepdims=True)
    adj = a / jnp.maximum(deg, 1.0)
    agg = adj @ x
    return agg @ w_l.T + x @ w_r.T + b_l[None, :]


if __name__ == "__main__":
    key = jax.random.PRNGKey(0)
    kx, ke, kd = jax.random.split(key, 3)

    N, C_IN, C_OUT, E = 64, 16, 32, 128
    x = jax.random.normal(kx, (N, C_IN), jnp.float32)
    edge_index = jax.random.randint(ke, (2, E), 0, N, dtype=jnp.int32)

    model = GCNPallas(C_IN, C_OUT, dropout=0.5, key=jax.random.PRNGKey(42))

    # eval-mode pass (deterministic) — verify against pure-JAX f32 reference.
    # Only x @ W_l^T is bf16-quantized; counts are exact int8, 1/deg and the root
    # term are f32, so the tolerance is tighter than the previous revision.
    out_eval = model(x, edge_index, training=False)
    jax.block_until_ready(out_eval)
    ref = _reference_eval(x, edge_index, model.w_l, model.b_l, model.w_r)
    np.testing.assert_allclose(np.asarray(out_eval), np.asarray(ref),
                               rtol=2e-2, atol=2e-2)

    # training-mode pass (wrapper-side dropout mask); just execute it
    out_train = model(x, edge_index, training=True, rng_key=kd)
    jax.block_until_ready(out_train)
    assert out_train.shape == (N, C_OUT)

    print("KERNEL_OK")
</pallas_src>

<mosaic_0001>
module attributes {stable_mosaic.version = 11 : i64} {
  func.func @_sage_kernel(%arg0: i32, %arg1: i32, %arg2: memref<128x128xi8, #tpu.memory_space<vmem>>, %arg3: memref<128x128xbf16, #tpu.memory_space<vmem>>, %arg4: memref<128x1xf32, #tpu.memory_space<vmem>>, %arg5: memref<128x128xf32, #tpu.memory_space<vmem>>, %arg6: memref<128x128xf32, #tpu.memory_space<vmem>>) attributes {dimension_semantics = [#tpu.dimension_semantics<parallel>, #tpu.dimension_semantics<arbitrary>], iteration_bounds = array<i64: 1, 1>, scalar_prefetch = 0 : i64, scratch_operands = 0 : i64, tpu.core_type = #tpu.core_type<tc>, window_params = [{transform_indices = @transform_0, window_bounds = array<i64: 128, 128>}, {transform_indices = @transform_1, window_bounds = array<i64: 128, 128>}, {transform_indices = @transform_2, window_bounds = array<i64: 128, 1>}, {transform_indices = @transform_3, window_bounds = array<i64: 128, 128>}, {transform_indices = @transform_4, window_bounds = array<i64: 128, 128>}]} {
    %c0_i32 = arith.constant 0 : i32
    %0 = arith.cmpi eq, %arg1, %c0_i32 : i32
    %1 = arith.extui %0 : i1 to i32
    %c0_i32_0 = arith.constant 0 : i32
    %2 = arith.cmpi ne, %1, %c0_i32_0 : i32
    scf.if %2 {
      %cst_10 = arith.constant 0.000000e+00 : f32
      %13 = vector.broadcast %cst_10 : f32 to vector<128x128xf32>
      %c0_11 = arith.constant 0 : index
      %c0_12 = arith.constant 0 : index
      %14 = vector.load %arg6[%c0_11, %c0_12] : memref<128x128xf32, #tpu.memory_space<vmem>>, vector<128x128xf32>
      tpu.vector_store %arg6[%c0_11, %c0_12], %13 {strides = array<i32>} : memref<128x128xf32, #tpu.memory_space<vmem>>, vector<128x128xf32>,
    } else {
    }
    %c0 = arith.constant 0 : index
    %c0_1 = arith.constant 0 : index
    %3 = vector.load %arg2[%c0, %c0_1] : memref<128x128xi8, #tpu.memory_space<vmem>>, vector<128x128xi8>
    %4 = arith.sitofp %3 : vector<128x128xi8> to vector<128x128xbf16>
    %c0_2 = arith.constant 0 : index
    %c0_3 = arith.constant 0 : index
    %5 = vector.load %arg6[%c0_2, %c0_3] : memref<128x128xf32, #tpu.memory_space<vmem>>, vector<128x128xf32>
    %c0_4 = arith.constant 0 : index
    %c0_5 = arith.constant 0 : index
    %6 = vector.load %arg3[%c0_4, %c0_5] : memref<128x128xbf16, #tpu.memory_space<vmem>>, vector<128x128xbf16>
    %cst = arith.constant dense<0.000000e+00> : vector<128x128xf32>
    %7 = tpu.matmul %4, %6, %cst {dimension_numbers = #tpu.dot_dimension_numbers<[1], [0], [0], [1], [0, 0, 1, 1], [], []>} : vector<128x128xbf16>, vector<128x128xbf16>, vector<128x128xf32> -> vector<128x128xf32>
    %8 = arith.addf %5, %7 : vector<128x128xf32>
    %c0_6 = arith.constant 0 : index
    %c0_7 = arith.constant 0 : index
    %9 = vector.load %arg6[%c0_6, %c0_7] : memref<128x128xf32, #tpu.memory_space<vmem>>, vector<128x128xf32>
    tpu.vector_store %arg6[%c0_6, %c0_7], %8 {strides = array<i32>} : memref<128x128xf32, #tpu.memory_space<vmem>>, vector<128x128xf32>,
    %c0_i32_8 = arith.constant 0 : i32
    %10 = arith.cmpi eq, %arg1, %c0_i32_8 : i32
    %11 = arith.extui %10 : i1 to i32
    %c0_i32_9 = arith.constant 0 : i32
    %12 = arith.cmpi ne, %11, %c0_i32_9 : i32
    scf.if %12 {
      %c0_10 = arith.constant 0 : index
      %c0_11 = arith.constant 0 : index
      %13 = vector.load %arg6[%c0_10, %c0_11] : memref<128x128xf32, #tpu.memory_space<vmem>>, vector<128x128xf32>
      %c0_12 = arith.constant 0 : index
      %c0_13 = arith.constant 0 : index
      %14 = vector.load %arg4[%c0_12, %c0_13] : memref<128x1xf32, #tpu.memory_space<vmem>>, vector<128x1xf32>
      %15 = vector.broadcast %14 : vector<128x1xf32> to vector<128x128xf32>
      %16 = arith.mulf %13, %15 : vector<128x128xf32>
      %c0_14 = arith.constant 0 : index
      %c0_15 = arith.constant 0 : index
      %17 = vector.load %arg5[%c0_14, %c0_15] : memref<128x128xf32, #tpu.memory_space<vmem>>, vector<128x128xf32>
      %18 = arith.addf %16, %17 : vector<128x128xf32>
      %c0_16 = arith.constant 0 : index
      %c0_17 = arith.constant 0 : index
      %19 = vector.load %arg6[%c0_16, %c0_17] : memref<128x128xf32, #tpu.memory_space<vmem>>, vector<128x128xf32>
      tpu.vector_store %arg6[%c0_16, %c0_17], %18 {strides = array<i32>} : memref<128x128xf32, #tpu.memory_space<vmem>>, vector<128x128xf32>,
    } else {
    }
    return
  }
  func.func @transform_0(%arg0: i32, %arg1: i32) -> (i32, i32) {
    %c0_i32 = arith.constant 0 : i32
    return %arg0, %arg1 : i32, i32
  }
  func.func @transform_1(%arg0: i32, %arg1: i32) -> (i32, i32) {
    %c0_i32 = arith.constant 0 : i32
    %c0_i32_0 = arith.constant 0 : i32
    return %arg1, %c0_i32 : i32, i32
  }
  func.func @transform_2(%arg0: i32, %arg1: i32) -> (i32, i32) {
    %c0_i32 = arith.constant 0 : i32
    %c0_i32_0 = arith.constant 0 : i32
    return %arg0, %c0_i32 : i32, i32
  }
  func.func @transform_3(%arg0: i32, %arg1: i32) -> (i32, i32) {
    %c0_i32 = arith.constant 0 : i32
    %c0_i32_0 = arith.constant 0 : i32
    return %arg0, %c0_i32 : i32, i32
  }
  func.func @transform_4(%arg0: i32, %arg1: i32) -> (i32, i32) {
    %c0_i32 = arith.constant 0 : i32
    %c0_i32_0 = arith.constant 0 : i32
    return %arg0, %c0_i32 : i32, i32
  }
}

</mosaic_0001>

<bundles_post_ra>
// kernel: tpu_custom_call.1
= control target key start
LH: loop header
LB: loop body
LE: loop exit
PB: predicated region body
PF: predicated region fallthrough
CT: control target
= control target key end

     0   :  { %9 = vsyncpa [#allocation3], 0  ;;  %s836_s0 = inlined_call_operand.hbm [shape: s8[128,128], index: 0, kind: input, shape index: {}]   ;;  %s837_s1 = inlined_call_operand.hbm [shape: bf16[128,128], index: 1, kind: input, shape index: {}]   ;;  %s838_s2 = inlined_call_operand.vmem [shape: f32[128,1], index: 2, kind: input, shape index: {}]   ;;  %s839_s3 = inlined_call_operand.vmem [shape: f32[128,128], index: 3, kind: input, shape index: {}]   ;;  %s840_s4 = inlined_call_operand.hbm [shape: f32[128,128], index: 4, kind: output, shape index: {}]  }
   0x1   :  { %10 = vsyncpa [#allocation6], 0 }
   0x2   :  { %11 = vsyncpa [#allocation4], 0  ;;  %s648_s15 = smov [#allocation2]   ;;  %s576_s19 = scalar_lea.hbm %s836_s0, 512 }
   0x3   :  { %s17_s16 = sshll.u32 %s648_s15, 4  ;;  %p577_p0 = scmp.ne.s32.totalorder %s836_s0, %s576_s19  ;;  %s18_s16 = int_to_ptr.vmem [resolvable:$true] %s17_s16 }
   0x4   :  { %p580_p1 = scmp.lt.u32.totalorder %s576_s19, %s836_s0 }
   0x6   :  { %p582_p2 = pnand %p580_p1, %p577_p0 }
   0x8   :  { %585 = shalt.err (!%p582_p2)
}
   0x9   :  { %s586_s24 = scalar_lea.vmem %s18_s16, 512  ;;  %p591_p4 = scmp.lt.s32.totalorder %s18_s16, %s18_s16 }
   0xa   :  { %p587_p3 = scmp.ne.s32.totalorder %s18_s16, %s586_s24  ;;  %p592_p5 = scmp.lt.s32.totalorder %s586_s24, %s586_s24 }
   0xc   :  { %p593_p6 = por %p592_p5, %p591_p4 }
   0xe   :  { %p594_p7 = pnand %p593_p6, %p587_p3 }
  0x10   :  { %597 = shalt.err (!%p594_p7)
}
  0x11   :  { %s649_s25 = smov 128   ;;  %s650_s26 = smov 8  }
  0x12   :  { %23 = dma.hbm_to_vmem [thread:$0]  %s836_s0, 512, %s18_s16, [#allocation3], %s649_s25, %s649_s25, %s650_s26  }
  0x13   :  { %s651_s29 = smov [#allocation5]   ;;  %s598_s7 = scalar_lea.hbm %s837_s1, 1024 }
  0x14   :  { %s29_s30 = sshll.u32 %s651_s29, 4  ;;  %p599_p8 = scmp.ne.s32.totalorder %s837_s1, %s598_s7  ;;  %s30_s30 = int_to_ptr.vmem [resolvable:$true] %s29_s30 }
  0x15   :  { %p602_p9 = scmp.lt.u32.totalorder %s598_s7, %s837_s1 }
  0x17   :  { %p604_p10 = pnand %p602_p9, %p599_p8 }
  0x19   :  { %607 = shalt.err (!%p604_p10)
}
  0x1a   :  { %s608_s12 = scalar_lea.vmem %s30_s30, 1024  ;;  %p613_p12 = scmp.lt.s32.totalorder %s30_s30, %s30_s30 }
  0x1b   :  { %p609_p11 = scmp.ne.s32.totalorder %s30_s30, %s608_s12  ;;  %p614_p13 = scmp.lt.s32.totalorder %s608_s12, %s608_s12 }
  0x1d   :  { %p615_p0 = por %p614_p13, %p613_p12 }
  0x1f   :  { %p616_p1 = pnand %p615_p0, %p609_p11 }
  0x21   :  { %619 = shalt.err (!%p616_p1)
}
  0x22   :  { %s652_s0 = smov 64   ;;  %s653_s13 = smov 4  }
  0x23   :  { %35 = dma.hbm_to_vmem [thread:$0]  %s837_s1, 1024, %s30_s30, [#allocation6], %s652_s0, %s652_s0, %s653_s13  }
  0x24   :  { %642 = dma.done.wait [#allocation3], 512  }
  0x25   :  { %643 = vsyncadd [#allocation3], 4294966784 }
  0x26   :  { %644 = dma.done.wait [#allocation6], 1024  }
  0x27   :  { %645 = vsyncadd [#allocation6], 4294966272  ;;  %v654_v0 = vmov 0   ;;  %v568_v1 = vld [vmem:[#allocation5] sm:$0xff]   ;;  %v569_v2 = vld [vmem:[#allocation5 + $0x8] sm:$0xff]   ;;  %s655_s27 = smov [#allocation7]  }
  0x28   :  { %567 = vset.pattern.permute.xlu1 %v654_v0  ;;  %566 = vset.pattern.permute.xlu0 %v654_v0  ;;  %v570_v3 = vld [vmem:[#allocation5 + $0x10] sm:$0xff]   ;;  %v571_v4 = vld [vmem:[#allocation5 + $0x18] sm:$0xff]   ;;  %v708_v5 = vld [vmem:[#allocation2] sm:$0xff]  ;;  %s472_s28 = sshll.u32 %s655_s27, 4  ;;  %s473_s28 = int_to_ptr.vmem [resolvable:$true] %s472_s28 }
  0x29   :  { %509 = vmatprep.subr.bf16.mxu0 %v568_v1  ;;  %541 = vmatprep.subr.bf16.mxu1 %v568_v1  ;;  %v710_v6 = vld [vmem:[#allocation2 + $0x10] sm:$0xff]  ;;  %v71_v7 = vunpack.c.l.s8.bf16 %v708_v5  ;;  %v307_v10 = vld [vmem:[%s838_s2] sm:$0xff]  ;;  %v310_v11 = vld [vmem:[%s838_s2 + $0x18] sm:$0xff]  ;;  %v72_v27 = vunpack.c.h.s8.bf16 %v708_v5  ;;  %p625_p3 = scmp.lt.s32.totalorder %s473_s28, %s473_s28 }
  0x2a   :  { %510 = vmatpush3.bf16.msra.mxu0 %v568_v1  ;;  %549 = vmatpush3.bf16.msra.mxu1 %v568_v1  ;;  %v75_v8 = vunpack.c.l.s8.bf16 %v710_v6  ;;  %v309_v9 = vld [vmem:[%s838_s2 + $0x10] sm:$0xff]  ;;  %v308_v12 = vld [vmem:[%s838_s2 + $0x8] sm:$0xff]  ;;  %v572_v13 = vld [vmem:[#allocation5 + $0x20] sm:$0xff]   ;;  %v76_v28 = vunpack.c.h.s8.bf16 %v710_v6 }
  0x2b   :  { %511 = vmatprep.subr.bf16.mxu0 %v569_v2  ;;  %542 = vmatprep.subr.bf16.mxu1 %v569_v2  ;;  %v312_v14 = vld [vmem:[%s838_s2 + $0x28] sm:$0xff]  ;;  %v311_v15 = vld [vmem:[%s838_s2 + $0x20] sm:$0xff]  ;;  %v314_v17 = vld [vmem:[%s838_s2 + $0x38] sm:$0xff] }
  0x2c   :  { %335 = vperm.xlu1 %567, %v309_v9   ;;  %325 = vperm.xlu0 %566, %v307_v10   ;;  %v573_v16 = vld [vmem:[#allocation5 + $0x28] sm:$0xff]   ;;  %v313_v18 = vld [vmem:[%s838_s2 + $0x30] sm:$0xff]  ;;  %v315_v21 = vld [vmem:[%s838_s2 + $0x40] sm:$0xff] }
  0x2d   :  { %525 = vmatprep.mubr.bf16.mxu0 %v71_v7  ;;  %533 = vmatprep.mubr.bf16.mxu1 %v75_v8  ;;  %v574_v19 = vld [vmem:[#allocation5 + $0x30] sm:$0xff]   ;;  %v316_v20 = vld [vmem:[%s838_s2 + $0x48] sm:$0xff]  ;;  %v575_v22 = vld [vmem:[#allocation5 + $0x38] sm:$0xff]  }
  0x2e   :  { %512 = vmatpush3.bf16.msra.mxu0 %v569_v2  ;;  %550 = vmatpush3.bf16.msra.mxu1 %v569_v2  ;;  %v318_v23 = vld [vmem:[%s838_s2 + $0x58] sm:$0xff]  ;;  %v317_v24 = vld [vmem:[%s838_s2 + $0x50] sm:$0xff]  ;;  %v68_v25 = vld [vmem:[#allocation2 + $0x8] sm:$0xff] }
  0x2f   :  { %513 = vmatprep.subr.bf16.mxu0 %v570_v3  ;;  %543 = vmatprep.subr.bf16.mxu1 %v570_v3  ;;  %v70_v26 = vld [vmem:[#allocation2 + $0x18] sm:$0xff]  ;;  %v73_v29 = vunpack.c.l.s8.bf16 %v68_v25  ;;  %v320_v31 = vld [vmem:[%s838_s2 + $0x68] sm:$0xff]  ;;  %v319_v32 = vld [vmem:[%s838_s2 + $0x60] sm:$0xff]  ;;  %v74_v35 = vunpack.c.h.s8.bf16 %v68_v25 }
  0x30   :  { %340 = vperm.xlu1 %567, %v310_v11   ;;  %330 = vperm.xlu0 %566, %v308_v12   ;;  %v77_v30 = vunpack.c.l.s8.bf16 %v70_v26  ;;  %v322_v33 = vld [vmem:[%s838_s2 + $0x78] sm:$0xff]  ;;  %v321_v34 = vld [vmem:[%s838_s2 + $0x70] sm:$0xff]  ;;  %v78_v36 = vunpack.c.h.s8.bf16 %v70_v26  ;;  %v419_v60 = vld [vmem:[%s839_s3] sm:$0xff] }
  0x31   :  { %v421_v54 = vld [vmem:[%s839_s3 + $0x10] sm:$0xff]  ;;  %v427_v61 = vld [vmem:[%s839_s3 + $0x40] sm:$0xff]  ;;  %v422_v2 = vld [vmem:[%s839_s3 + $0x18] sm:$0xff] }
  0x32   :  { %514 = vmatpush3.bf16.msra.mxu0 %v570_v3  ;;  %551 = vmatpush3.bf16.msra.mxu1 %v570_v3  ;;  %v429_v55 = vld [vmem:[%s839_s3 + $0x50] sm:$0xff]  ;;  %v430_v3 = vld [vmem:[%s839_s3 + $0x58] sm:$0xff]  ;;  %v420_v8 = vld [vmem:[%s839_s3 + $0x8] sm:$0xff] }
  0x33   :  { %515 = vmatprep.subr.bf16.mxu0 %v571_v4  ;;  %544 = vmatprep.subr.bf16.mxu1 %v571_v4  ;;  %v428_v9 = vld [vmem:[%s839_s3 + $0x48] sm:$0xff]  ;;  %v433_v25 = vld [vmem:[%s839_s3 + $0x70] sm:$0xff] }
  0x34   :  { %350 = vperm.xlu1 %567, %v312_v14   ;;  %345 = vperm.xlu0 %566, %v311_v15  }
  0x36   :  { %516 = vmatpush3.bf16.msra.mxu0 %v571_v4  ;;  %552 = vmatpush3.bf16.msra.mxu1 %v571_v4 }
  0x37   :  { %517 = vmatprep.subr.bf16.mxu0 %v572_v13  ;;  %545 = vmatprep.subr.bf16.mxu1 %v572_v13 }
  0x38   :  { %360 = vperm.xlu1 %567, %v314_v17   ;;  %355 = vperm.xlu0 %566, %v313_v18  }
  0x3a   :  { %518 = vmatpush3.bf16.msra.mxu0 %v572_v13  ;;  %553 = vmatpush3.bf16.msra.mxu1 %v572_v13 }
  0x3b   :  { %519 = vmatprep.subr.bf16.mxu0 %v573_v16  ;;  %546 = vmatprep.subr.bf16.mxu1 %v573_v16 }
  0x3c   :  { %370 = vperm.xlu1 %567, %v316_v20   ;;  %365 = vperm.xlu0 %566, %v315_v21  }
  0x3e   :  { %520 = vmatpush3.bf16.msra.mxu0 %v573_v16  ;;  %554 = vmatpush3.bf16.msra.mxu1 %v573_v16 }
  0x3f   :  { %521 = vmatprep.subr.bf16.mxu0 %v574_v19  ;;  %547 = vmatprep.subr.bf16.mxu1 %v574_v19 }
  0x40   :  { %380 = vperm.xlu1 %567, %v318_v23   ;;  %375 = vperm.xlu0 %566, %v317_v24   ;;  %v425_v24 = vld [vmem:[%s839_s3 + $0x30] sm:$0xff] }
  0x42   :  { %522 = vmatpush3.bf16.msra.mxu0 %v574_v19  ;;  %555 = vmatpush3.bf16.msra.mxu1 %v574_v19 }
  0x43   :  { %523 = vmatprep.subr.bf16.mxu0 %v575_v22  ;;  %548 = vmatprep.subr.bf16.mxu1 %v575_v22 }
  0x44   :  { %390 = vperm.xlu1 %567, %v320_v31   ;;  %385 = vperm.xlu0 %566, %v319_v32   ;;  %v431_v31 = vld [vmem:[%s839_s3 + $0x60] sm:$0xff] }
  0x46   :  { %524 = vmatpush3.bf16.msra.mxu0 %v575_v22  ;;  %556 = vmatpush3.bf16.msra.mxu1 %v575_v22 }
  0x48   :  { %400 = vperm.xlu1 %567, %v322_v33   ;;  %395 = vperm.xlu0 %566, %v321_v34  }
  0x49   :  { %526 = vmatmul.mubr.bf16.vlgmr.msra.gmra.mrb[0].mxu0 %v72_v27  ;;  %534 = vmatmul.mubr.bf16.vlgmr.msra.gmra.mrb[0].mxu1 %v76_v28 }
  0x4a   :  { %529 = vmatprep.mubr.bf16.mxu0 %v73_v29  ;;  %537 = vmatprep.mubr.bf16.mxu1 %v77_v30  ;;  %v423_v30 = vld [vmem:[%s839_s3 + $0x20] sm:$0xff] }
  0x51   :  { %530 = vmatmul.mubr.bf16.gmra.mrb[4].mxu0 %v74_v35  ;;  %538 = vmatmul.mubr.bf16.gmra.mrb[4].mxu1 %v78_v36 }
  0xab   :  { %v326_v37 = vpop.permute.xlu0 %325  ;;  %v336_v38 = vpop.permute.xlu1 %335 }
  0xaf   :  { %v331_v39 = vpop.permute.xlu0 %330  ;;  %v341_v40 = vpop.permute.xlu1 %340 }
  0xb3   :  { %v764_v41 = vpop.permute.xlu0 %345  ;;  %v766_v42 = vpop.permute.xlu1 %350 }
  0xb7   :  { %v356_v43 = vpop.permute.xlu0 %355  ;;  %v768_v44 = vpop.permute.xlu1 %360 }
  0xbb   :  { %v366_v45 = vpop.permute.xlu0 %365  ;;  %v371_v46 = vpop.permute.xlu1 %370 }
  0xbf   :  { %v376_v47 = vpop.permute.xlu0 %375  ;;  %v381_v48 = vpop.permute.xlu1 %380 }
  0xc3   :  { %v386_v49 = vpop.permute.xlu0 %385  ;;  %v391_v10 = vpop.permute.xlu1 %390 }
  0xc7   :  { %v396_v15 = vpop.permute.xlu0 %395  ;;  %v401_v34 = vpop.permute.xlu1 %400 }
 0x11c   :  { %v527_v50 = vpop.f32.mrb[0].mxu0  ;;  %v535_v51 = vpop.f32.mrb[0].mxu1 }
 0x11d   :  { %v193_v52 = vpop.f32.mrb[1].mxu0  ;;  %v225_v53 = vpop.f32.mrb[1].mxu1  ;;  %v405_v58 = vmul.f32 %v527_v50, %v336_v38  ;;  %v413_v59 = vmul.f32 %v535_v51, %v376_v47  ;;  %v434_v38 = vld [vmem:[%s839_s3 + $0x78] sm:$0xff] }
 0x11e   :  { %v528_v56 = vpop.f32.mrb[2].mxu0  ;;  %v536_v57 = vpop.f32.mrb[2].mxu1  ;;  %v403_v0 = vmul.f32 %v326_v37, %v193_v52  ;;  %v411_v1 = vmul.f32 %v366_v45, %v225_v53  ;;  %v426_v37 = vld [vmem:[%s839_s3 + $0x38] sm:$0xff] }
 0x11f   :  { %v196_v62 = vpop.f32.mrb[3].mxu0  ;;  %v228_v63 = vpop.f32.mrb[3].mxu1  ;;  %v437_v4 = vadd.f32 %v421_v54, %v405_v58  ;;  %v445_v5 = vadd.f32 %v429_v55, %v413_v59  ;;  %v406_v6 = vmul.f32 %v528_v56, %v341_v40  ;;  %v414_v7 = vmul.f32 %v536_v57, %v381_v48 }
 0x120   :  { %v435_v11 = vadd.f32 %v419_v60, %v403_v0  ;;  %v443_v12 = vadd.f32 %v427_v61, %v411_v1  ;;  %v404_v13 = vmul.f32 %v331_v39, %v196_v62  ;;  %v412_v14 = vmul.f32 %v371_v46, %v228_v63  ;;  %v424_v46 = vld [vmem:[%s839_s3 + $0x28] sm:$0xff] }
 0x121   :  { %453 = vst [vmem:[#allocation7 + $0x10] sm:$0xff] %v437_v4  ;;  %461 = vst [vmem:[#allocation7 + $0x50] sm:$0xff] %v445_v5  ;;  %v438_v16 = vadd.f32 %v422_v2, %v406_v6  ;;  %v446_v17 = vadd.f32 %v430_v3, %v414_v7 }
 0x122   :  { %451 = vst [vmem:[#allocation7] sm:$0xff] %v435_v11  ;;  %459 = vst [vmem:[#allocation7 + $0x40] sm:$0xff] %v443_v12  ;;  %v436_v18 = vadd.f32 %v420_v8, %v404_v13  ;;  %v444_v19 = vadd.f32 %v428_v9, %v412_v14 }
 0x123   :  { %454 = vst [vmem:[#allocation7 + $0x18] sm:$0xff] %v438_v16  ;;  %462 = vst [vmem:[#allocation7 + $0x58] sm:$0xff] %v446_v17 }
 0x124   :  { %v531_v20 = vpop.f32.mrb[4].mxu0  ;;  %v539_v21 = vpop.f32.mrb[4].mxu1  ;;  %452 = vst [vmem:[#allocation7 + $0x8] sm:$0xff] %v436_v18  ;;  %460 = vst [vmem:[#allocation7 + $0x48] sm:$0xff] %v444_v19 }
 0x125   :  { %v209_v22 = vpop.f32.mrb[5].mxu0  ;;  %v241_v23 = vpop.f32.mrb[5].mxu1  ;;  %v409_v28 = vmul.f32 %v531_v20, %v356_v43  ;;  %v417_v29 = vmul.f32 %v539_v21, %v396_v15 }
 0x126   :  { %v532_v26 = vpop.f32.mrb[6].mxu0  ;;  %v540_v27 = vpop.f32.mrb[6].mxu1  ;;  %v407_v35 = vmul.f32 %v764_v41, %v209_v22  ;;  %v415_v36 = vmul.f32 %v386_v49, %v241_v23  ;;  %v432_v41 = vld [vmem:[%s839_s3 + $0x68] sm:$0xff]  ;;  %s620_s3 = scalar_lea.vmem %s473_s28, 2048 }
 0x127   :  { %v212_v32 = vpop.f32.mrb[7].mxu0  ;;  %v244_v33 = vpop.f32.mrb[7].mxu1  ;;  %v441_v39 = vadd.f32 %v425_v24, %v409_v28  ;;  %v449_v40 = vadd.f32 %v433_v25, %v417_v29  ;;  %v410_v43 = vmul.f32 %v532_v26, %v768_v44  ;;  %v418_v45 = vmul.f32 %v540_v27, %v401_v34  ;;  %p621_p2 = scmp.ne.s32.totalorder %s473_s28, %s620_s3  ;;  %p626_p4 = scmp.lt.s32.totalorder %s620_s3, %s620_s3 }
 0x128   :  { %v439_v47 = vadd.f32 %v423_v30, %v407_v35  ;;  %v447_v48 = vadd.f32 %v431_v31, %v415_v36  ;;  %v408_v49 = vmul.f32 %v766_v42, %v212_v32  ;;  %v416_v50 = vmul.f32 %v391_v10, %v244_v33 }
 0x129   :  { %457 = vst [vmem:[#allocation7 + $0x30] sm:$0xff] %v441_v39  ;;  %465 = vst [vmem:[#allocation7 + $0x70] sm:$0xff] %v449_v40  ;;  %v442_v51 = vadd.f32 %v426_v37, %v410_v43  ;;  %v450_v44 = vadd.f32 %v434_v38, %v418_v45  ;;  %p627_p5 = por %p626_p4, %p625_p3 }
 0x12a   :  { %455 = vst [vmem:[#allocation7 + $0x20] sm:$0xff] %v439_v47  ;;  %463 = vst [vmem:[#allocation7 + $0x60] sm:$0xff] %v447_v48  ;;  %v440_v52 = vadd.f32 %v424_v46, %v408_v49  ;;  %v448_v53 = vadd.f32 %v432_v41, %v416_v50 }
 0x12b   :  { %458 = vst [vmem:[#allocation7 + $0x38] sm:$0xff] %v442_v51  ;;  %466 = vst [vmem:[#allocation7 + $0x78] sm:$0xff] %v450_v44  ;;  %p628_p6 = pnand %p627_p5, %p621_p2 }
 0x12c   :  { %456 = vst [vmem:[#allocation7 + $0x28] sm:$0xff] %v440_v52  ;;  %464 = vst [vmem:[#allocation7 + $0x68] sm:$0xff] %v448_v53 }
 0x12d   :  { %631 = shalt.err (!%p628_p6)
}
 0x12e   :  { %s632_s5 = scalar_lea.hbm %s840_s4, 2048 }
 0x12f   :  { %p633_p7 = scmp.ne.s32.totalorder %s840_s4, %s632_s5  ;;  %p636_p8 = scmp.lt.u32.totalorder %s632_s5, %s840_s4 }
 0x131   :  { %p638_p9 = pnand %p636_p8, %p633_p7 }
 0x133   :  { %641 = shalt.err (!%p638_p9)
}
 0x134   :  { %478 = dma.vmem_to_hbm [thread:$0]  %s473_s28, 2048, %s840_s4, [#allocation4], %s649_s25, %s649_s25, %s650_s26  }
 0x135   :  { %646 = dma.done.wait [#allocation4], 2048  }
 0x136   :  { %647 = vsyncadd [#allocation4], 4294965248 }
 0x137   :  { %482 = vsyncpa [#allocation3], 1 }
 0x138   :  { %483 = vsyncpa [#allocation6], 1 }
 0x139   :  { %484 = vsyncpa [#allocation4], 1 }

</bundles_post_ra>
